<compile_context>
chip_gen: v7x
topology: tpu7x:2x2x1
jax: 0.10.0
libtpu: 0.0.40
codegen_flags: <defaults>
</compile_context>

<pallas_src>
import functools
import math
from typing import NamedTuple

import jax
import jax.numpy as jnp
from jax.experimental import pallas as pl
from jax.experimental.pallas import tpu as pltpu


def _round_up(x, m):
    return ((x + m - 1) // m) * m


# ---------------------------------------------------------------------------
# Tile selection
# ---------------------------------------------------------------------------

def _choose_k_tile(k):
    """Returns (tk, k_pad). Prefers full-extent K blocks (no padding)."""
    if k % 128 != 0 and k <= 1024:
        return k, k                      # full-K block: legal, no pad, 1 k-step
    k_pad = k if k % 128 == 0 else _round_up(k, 128)
    tk = 128
    for cand in range(min(1024, k_pad), 127, -128):
        if k_pad % cand == 0:
            tk = cand
            break
    return tk, k_pad


def _choose_n_tile(n):
    """Returns (tn, n_pad). Output features land on lanes (lane-dense stores)."""
    n_pad = _round_up(n, 128)
    tn = 128
    for cand in range(min(512, n_pad), 127, -128):
        if n_pad % cand == 0:
            tn = cand
            break
    return tn, n_pad


def _choose_m_tile(m):
    """Returns (tm, m_pad), minimizing padded rows."""
    if m <= 512:
        tm = _round_up(m, 8)
        return tm, tm
    best_tm, best_pad = 128, None
    for cand in (512, 256, 128):
        pad = _round_up(m, cand) - m
        if best_pad is None or pad < best_pad:
            best_tm, best_pad = cand, pad
    return best_tm, _round_up(m, best_tm)


# ---------------------------------------------------------------------------
# Parameter preparation (one-time, hoisted out of the forward path)
# ---------------------------------------------------------------------------

class LinearParams(NamedTuple):
    w_kn: jax.Array       # (k_pad, n_pad)  pre-transposed + pre-padded weight
    b_1n: jax.Array       # (1, n_pad)      pre-padded bias
    in_features: int
    out_features: int
    tk: int
    tn: int


def prepare_linear_params(weight, bias):
    """One-time layout transform of the torch-layout weight (N, K) -> (K_pad, N_pad)."""
    n, k = weight.shape
    tk, k_pad = _choose_k_tile(k)
    tn, n_pad = _choose_n_tile(n)

    w_kn = weight.T                                       # (K, N): out-features on lanes
    if k_pad > k or n_pad > n:
        w_kn = jnp.pad(w_kn, ((0, k_pad - k), (0, n_pad - n)))
    b_1n = bias.reshape(1, n)
    if n_pad > n:
        b_1n = jnp.pad(b_1n, ((0, 0), (0, n_pad - n)))

    return LinearParams(
        w_kn=jax.device_put(w_kn),
        b_1n=jax.device_put(b_1n),
        in_features=k,
        out_features=n,
        tk=tk,
        tn=tn,
    )


# ---------------------------------------------------------------------------
# Kernels
# ---------------------------------------------------------------------------

def _linear_kernel_f32(x_ref, w_ref, b_ref, o_ref):
    # f32 output: accumulate directly into the resident output block.
    @pl.when(pl.program_id(2) == 0)
    def _():
        o_ref[...] = jnp.broadcast_to(b_ref[...], o_ref.shape)

    o_ref[...] += jnp.dot(
        x_ref[...], w_ref[...], preferred_element_type=jnp.float32
    )


def _linear_kernel_acc(x_ref, w_ref, b_ref, o_ref, acc_ref):
    # Low-precision output: f32 VMEM accumulator, cast on the last k step.
    @pl.when(pl.program_id(2) == 0)
    def _():
        acc_ref[...] = jnp.broadcast_to(b_ref[...], acc_ref.shape).astype(jnp.float32)

    acc_ref[...] += jnp.dot(
        x_ref[...], w_ref[...], preferred_element_type=jnp.float32
    )

    @pl.when(pl.program_id(2) == pl.num_programs(2) - 1)
    def _():
        o_ref[...] = acc_ref[...].astype(o_ref.dtype)


# ---------------------------------------------------------------------------
# pallas_call wrapper
# ---------------------------------------------------------------------------

@functools.partial(jax.jit, static_argnames=("tm", "tn", "tk"))
def _pallas_linear(x_p, w_p, b_p, *, tm, tn, tk):
    m_pad, k_pad = x_p.shape
    _, n_pad = w_p.shape
    out_dtype = x_p.dtype

    m_blocks = m_pad // tm
    n_blocks = n_pad // tn
    grid = (m_blocks, n_blocks, k_pad // tk)

    use_direct = jnp.dtype(out_dtype) == jnp.dtype(jnp.float32)
    kernel = _linear_kernel_f32 if use_direct else _linear_kernel_acc
    scratch_shapes = [] if use_direct else [pltpu.VMEM((tm, tn), jnp.float32)]

    # Advisory cost estimate with real re-read factors and dtype sizes.
    xb = x_p.dtype.itemsize
    wb = w_p.dtype.itemsize
    bb = b_p.dtype.itemsize
    ob = jnp.dtype(out_dtype).itemsize
    cost = pl.CostEstimate(
        flops=2 * m_pad * k_pad * n_pad,
        transcendentals=0,
        bytes_accessed=(
            m_pad * k_pad * xb * n_blocks        # x streamed once per N tile
            + k_pad * n_pad * wb * m_blocks      # W streamed once per M tile
            + n_pad * bb * m_blocks * n_blocks   # bias per output tile
            + m_pad * n_pad * ob                 # output writeback
        ),
    )

    # Double-buffered inputs + output + (optional) scratch, with headroom;
    # capped at 48 MiB to stay safe on v7x (64 MiB physical VMEM).
    est_vmem = (
        2 * (tm * tk * xb + tk * tn * wb + tn * bb)
        + 2 * tm * tn * ob
        + (0 if use_direct else tm * tn * 4)
    )
    vmem_limit = int(min(48 * 1024 * 1024, max(2 * est_vmem, 32 * 1024 * 1024)))

    return pl.pallas_call(
        kernel,
        out_shape=jax.ShapeDtypeStruct((m_pad, n_pad), out_dtype),
        grid_spec=pltpu.PrefetchScalarGridSpec(
            num_scalar_prefetch=0,
            grid=grid,
            in_specs=[
                pl.BlockSpec((tm, tk), lambda i, j, k: (i, k)),
                pl.BlockSpec((tk, tn), lambda i, j, k: (k, j)),
                pl.BlockSpec((1, tn), lambda i, j, k: (0, j)),
            ],
            out_specs=pl.BlockSpec((tm, tn), lambda i, j, k: (i, j)),
            scratch_shapes=scratch_shapes,
        ),
        compiler_params=pltpu.CompilerParams(
            dimension_semantics=("parallel", "parallel", "arbitrary"),
            vmem_limit_bytes=vmem_limit,
        ),
        cost_estimate=cost,
    )(x_p, w_p, b_p)


def linear_forward(x, params: LinearParams):
    """nn.Linear forward: y = x @ weight.T + bias, using pre-laid-out params."""
    k = params.in_features
    n = params.out_features
    *lead, k_in = x.shape
    assert k_in == k, (k_in, k)

    m = math.prod(lead) if lead else 1
    x2 = x.reshape(m, k)

    k_pad, n_pad = params.w_kn.shape
    tm, m_pad = _choose_m_tile(m)
    tn, tk = params.tn, params.tk

    # v7x has 2 TensorCores: make sure at least one "parallel" axis has >= 2
    # blocks when the problem allows it.
    if m_pad // tm == 1 and n_pad // tn == 1 and n_pad >= 256:
        half = n_pad // 2
        tn = half if half % 128 == 0 else 128

    # Pad the activation only when actually required (aligned shapes: no-op).
    if m_pad > m or k_pad > k:
        x2 = jnp.pad(x2, ((0, m_pad - m), (0, k_pad - k)))

    y_pad = _pallas_linear(x2, params.w_kn, params.b_1n, tm=tm, tn=tn, tk=tk)

    y = y_pad
    if m_pad > m or n_pad > n:
        y = y_pad[:m, :n]
    return y.reshape(*lead, n)


def init_linear_params(key, in_features, out_features):
    """Match the torch module's init:
    kaiming_normal_(weight) -> normal * sqrt(2 / fan_in), fan_in = in_features
    constant_(bias, 0)
    """
    std = math.sqrt(2.0 / in_features)
    w = std * jax.random.normal(key, (out_features, in_features), dtype=jnp.float32)
    b = jnp.zeros((out_features,), dtype=jnp.float32)
    return w, b


if __name__ == "__main__":
    key = jax.random.PRNGKey(0)
    in_features, out_features = 32, 64
    batch, seq = 2, 8

    key, xkey, wkey = jax.random.split(key, 3)
    x = jax.random.normal(xkey, (batch, seq, in_features), dtype=jnp.float32)
    w, b = init_linear_params(wkey, in_features, out_features)

    # One-time weight layout transform (hoisted out of the forward path).
    params = prepare_linear_params(w, b)

    y = linear_forward(x, params)
    y = jax.block_until_ready(y)

    # Correctness vs. pure-JAX reference of nn.Linear forward.
    y_ref = x @ w.T + b
    assert y.shape == (batch, seq, out_features)
    assert bool(jnp.allclose(y, y_ref, atol=1e-5, rtol=1e-5)), "mismatch vs reference"

    print("KERNEL_OK")
</pallas_src>

<mosaic_0001>
module attributes {stable_mosaic.version = 11 : i64} {
  func.func @_linear_kernel_f32(%arg0: i32, %arg1: i32, %arg2: i32, %arg3: memref<16x32xf32, #tpu.memory_space<vmem>>, %arg4: memref<32x128xf32, #tpu.memory_space<vmem>>, %arg5: memref<1x128xf32, #tpu.memory_space<vmem>>, %arg6: memref<16x128xf32, #tpu.memory_space<vmem>>) attributes {dimension_semantics = [#tpu.dimension_semantics<parallel>, #tpu.dimension_semantics<parallel>, #tpu.dimension_semantics<arbitrary>], iteration_bounds = array<i64: 1, 1, 1>, scalar_prefetch = 0 : i64, scratch_operands = 0 : i64, tpu.core_type = #tpu.core_type<tc>, window_params = [{transform_indices = @transform_0, window_bounds = array<i64: 16, 32>}, {transform_indices = @transform_1, window_bounds = array<i64: 32, 128>}, {transform_indices = @transform_2, window_bounds = array<i64: 1, 128>}, {transform_indices = @transform_3, window_bounds = array<i64: 16, 128>}]} {
    %c0_i32 = arith.constant 0 : i32
    %0 = arith.cmpi eq, %arg2, %c0_i32 : i32
    %1 = arith.extui %0 : i1 to i32
    %c0_i32_0 = arith.constant 0 : i32
    %2 = arith.cmpi ne, %1, %c0_i32_0 : i32
    scf.if %2 {
      %c0_8 = arith.constant 0 : index
      %c0_9 = arith.constant 0 : index
      %9 = vector.load %arg5[%c0_8, %c0_9] : memref<1x128xf32, #tpu.memory_space<vmem>>, vector<1x128xf32>
      %10 = vector.shape_cast %9 : vector<1x128xf32> to vector<1x128xf32>
      %11 = vector.broadcast %10 : vector<1x128xf32> to vector<16x128xf32>
      %c0_10 = arith.constant 0 : index
      %c0_11 = arith.constant 0 : index
      %12 = vector.load %arg6[%c0_10, %c0_11] : memref<16x128xf32, #tpu.memory_space<vmem>>, vector<16x128xf32>
      tpu.vector_store %arg6[%c0_10, %c0_11], %11 {strides = array<i32>} : memref<16x128xf32, #tpu.memory_space<vmem>>, vector<16x128xf32>,
    } else {
    }
    %c0 = arith.constant 0 : index
    %c0_1 = arith.constant 0 : index
    %3 = vector.load %arg6[%c0, %c0_1] : memref<16x128xf32, #tpu.memory_space<vmem>>, vector<16x128xf32>
    %c0_2 = arith.constant 0 : index
    %c0_3 = arith.constant 0 : index
    %4 = vector.load %arg3[%c0_2, %c0_3] : memref<16x32xf32, #tpu.memory_space<vmem>>, vector<16x32xf32>
    %c0_4 = arith.constant 0 : index
    %c0_5 = arith.constant 0 : index
    %5 = vector.load %arg4[%c0_4, %c0_5] : memref<32x128xf32, #tpu.memory_space<vmem>>, vector<32x128xf32>
    %cst = arith.constant dense<0.000000e+00> : vector<16x128xf32>
    %6 = tpu.matmul %4, %5, %cst {dimension_numbers = #tpu.dot_dimension_numbers<[1], [0], [0], [1], [0, 0, 1, 1], [], []>} : vector<16x32xf32>, vector<32x128xf32>, vector<16x128xf32> -> vector<16x128xf32>
    %7 = arith.addf %3, %6 : vector<16x128xf32>
    %c0_6 = arith.constant 0 : index
    %c0_7 = arith.constant 0 : index
    %8 = vector.load %arg6[%c0_6, %c0_7] : memref<16x128xf32, #tpu.memory_space<vmem>>, vector<16x128xf32>
    tpu.vector_store %arg6[%c0_6, %c0_7], %7 {strides = array<i32>} : memref<16x128xf32, #tpu.memory_space<vmem>>, vector<16x128xf32>,
    return
  }
  func.func @transform_0(%arg0: i32, %arg1: i32, %arg2: i32) -> (i32, i32) {
    %c0_i32 = arith.constant 0 : i32
    return %arg0, %arg2 : i32, i32
  }
  func.func @transform_1(%arg0: i32, %arg1: i32, %arg2: i32) -> (i32, i32) {
    %c0_i32 = arith.constant 0 : i32
    return %arg2, %arg1 : i32, i32
  }
  func.func @transform_2(%arg0: i32, %arg1: i32, %arg2: i32) -> (i32, i32) {
    %c0_i32 = arith.constant 0 : i32
    %c0_i32_0 = arith.constant 0 : i32
    return %c0_i32, %arg1 : i32, i32
  }
  func.func @transform_3(%arg0: i32, %arg1: i32, %arg2: i32) -> (i32, i32) {
    %c0_i32 = arith.constant 0 : i32
    return %arg0, %arg1 : i32, i32
  }
}

</mosaic_0001>

<bundles_post_ra>
// kernel: _pallas_linear.1
= control target key start
LH: loop header
LB: loop body
LE: loop exit
PB: predicated region body
PF: predicated region fallthrough
CT: control target
= control target key end

     0   :  { %8 = vsyncpa [#allocation3], 0  ;;  %s346_s0 = inlined_call_operand.hbm [shape: f32[16,32], index: 0, kind: input, shape index: {}]   ;;  %s347_s1 = inlined_call_operand.hbm [shape: f32[32,128], index: 1, kind: input, shape index: {}]   ;;  %s348_s2 = inlined_call_operand.vmem [shape: f32[1,128], index: 2, kind: input, shape index: {}]   ;;  %s349_s3 = inlined_call_operand.hbm [shape: f32[16,128], index: 3, kind: output, shape index: {}]  }
   0x1   :  { %9 = vsyncpa [#allocation6], 0 }
   0x2   :  { %10 = vsyncpa [#allocation4], 0  ;;  %s273_s12 = smov [#allocation2]   ;;  %s201_s16 = scalar_lea.hbm %s346_s0, 256 }
   0x3   :  { %s16_s13 = sshll.u32 %s273_s12, 4  ;;  %p202_p0 = scmp.ne.s32.totalorder %s346_s0, %s201_s16  ;;  %s17_s13 = int_to_ptr.vmem [resolvable:$true] %s16_s13 }
   0x4   :  { %p205_p1 = scmp.lt.u32.totalorder %s201_s16, %s346_s0 }
   0x6   :  { %p207_p2 = pnand %p205_p1, %p202_p0 }
   0x8   :  { %210 = shalt.err (!%p207_p2)
}
   0x9   :  { %s211_s21 = scalar_lea.vmem %s17_s13, 256  ;;  %p216_p4 = scmp.lt.s32.totalorder %s17_s13, %s17_s13 }
   0xa   :  { %p212_p3 = scmp.ne.s32.totalorder %s17_s13, %s211_s21  ;;  %p217_p5 = scmp.lt.s32.totalorder %s211_s21, %s211_s21 }
   0xc   :  { %p218_p6 = por %p217_p5, %p216_p4 }
   0xe   :  { %p219_p7 = pnand %p218_p6, %p212_p3 }
  0x10   :  { %222 = shalt.err (!%p219_p7)
}
  0x11   :  { %s274_s22 = smov 128   ;;  %s275_s23 = smov 8  }
  0x12   :  { %22 = dma.hbm_to_vmem [thread:$0]  %s346_s0, 256, %s17_s13, [#allocation3], %s274_s22, %s274_s22, %s275_s23  }
  0x13   :  { %s276_s26 = smov [#allocation5]   ;;  %s223_s30 = scalar_lea.hbm %s347_s1, 512 }
  0x14   :  { %s28_s27 = sshll.u32 %s276_s26, 4  ;;  %p224_p8 = scmp.ne.s32.totalorder %s347_s1, %s223_s30  ;;  %s29_s27 = int_to_ptr.vmem [resolvable:$true] %s28_s27 }
  0x15   :  { %p227_p9 = scmp.lt.u32.totalorder %s223_s30, %s347_s1 }
  0x17   :  { %p229_p10 = pnand %p227_p9, %p224_p8 }
  0x19   :  { %232 = shalt.err (!%p229_p10)
}
  0x1a   :  { %s233_s8 = scalar_lea.vmem %s29_s27, 512  ;;  %p238_p12 = scmp.lt.s32.totalorder %s29_s27, %s29_s27 }
  0x1b   :  { %p234_p11 = scmp.ne.s32.totalorder %s29_s27, %s233_s8  ;;  %p239_p13 = scmp.lt.s32.totalorder %s233_s8, %s233_s8 }
  0x1d   :  { %p240_p0 = por %p239_p13, %p238_p12 }
  0x1f   :  { %p241_p1 = pnand %p240_p0, %p234_p11 }
  0x21   :  { %244 = shalt.err (!%p241_p1)
}
  0x22   :  { %34 = dma.hbm_to_vmem [thread:$0]  %s347_s1, 512, %s29_s27, [#allocation6], %s274_s22, %s274_s22, %s275_s23  }
  0x23   :  { %267 = dma.done.wait [#allocation3], 256  }
  0x24   :  { %268 = vsyncadd [#allocation3], 4294967040 }
  0x25   :  { %269 = dma.done.wait [#allocation6], 512  }
  0x26   :  { %270 = vsyncadd [#allocation6], 4294966784  ;;  %vm64_vm0 = vcmask 261120   ;;  %v60_v0 = vld [vmem:[#allocation5] sm:$0xff]  ;;  %v61_v1 = vld [vmem:[#allocation5 + $0x8] sm:$0xff]  ;;  %s277_s11 = smov [#allocation7]  }
  0x27   :  { %v62_v2 = vld [vmem:[#allocation5 + $0x10] sm:$0xff]  ;;  %v188_v3 = vpack.c.bf16 %v61_v1, %v60_v0  ;;  %v63_v4 = vld [vmem:[#allocation5 + $0x18] sm:$0xff]  ;;  %s155_s12 = sshll.u32 %s277_s11, 4  ;;  %s156_s12 = int_to_ptr.vmem [resolvable:$true] %s155_s12 }
  0x28   :  { %v58_v5 = vld [vmem:[#allocation2] sm:$0xff]  ;;  %v192_v6 = vpack.c.bf16 %v63_v4, %v62_v2  ;;  %v59_v7 = vld [vmem:[#allocation2 + $0x8] sm:$0xff]  ;;  %s245_s13 = scalar_lea.vmem %s156_s12, 256  ;;  %p250_p3 = scmp.lt.s32.totalorder %s156_s12, %s156_s12 }
  0x29   :  { %185 = vmatprep.mubr.msk.f32.mxu0 %vm64_vm0, %v58_v5  ;;  %189 = vmatprep.subr.bf16.mxu0 %v188_v3  ;;  %v168_v8 = vld [vmem:[%s348_s2] ss:$0 sm:$0xff]  ;;  %p246_p2 = scmp.ne.s32.totalorder %s156_s12, %s245_s13  ;;  %p251_p4 = scmp.lt.s32.totalorder %s245_s13, %s245_s13 }
  0x2a   :  { %191 = vmatpush3.bf16.msra.mxu0 %v188_v3 }
  0x2b   :  { %193 = vmatprep.subr.bf16.mxu0 %v192_v6  ;;  %p252_p5 = por %p251_p4, %p250_p3 }
  0x2d   :  { %p253_p6 = pnand %p252_p5, %p246_p2 }
  0x2e   :  { %195 = vmatpush3.bf16.msra.mxu0 %v192_v6 }
  0x31   :  { %186 = vmatmul.mubr.msk.f32.vlgmr.msra.gmra.mrb[0].mxu0 %vm64_vm0, %v59_v7 }
 0x104   :  { %v187_v9 = vpop.f32.mrb[0].mxu0 }
 0x105   :  { %v147_v10 = vadd.f32 %v187_v9, %v168_v8  ;;  %v137_v11 = vpop.f32.mrb[1].mxu0 }
 0x106   :  { %v146_v12 = vadd.f32 %v168_v8, %v137_v11 }
 0x107   :  { %149 = vst [vmem:[#allocation7 + $0x8] sm:$0xff] %v147_v10 }
 0x108   :  { %148 = vst [vmem:[#allocation7] sm:$0xff] %v146_v12 }
 0x109   :  { %256 = shalt.err (!%p253_p6)
}
 0x10a   :  { %s257_s2 = scalar_lea.hbm %s349_s3, 256 }
 0x10b   :  { %p258_p7 = scmp.ne.s32.totalorder %s349_s3, %s257_s2  ;;  %p261_p8 = scmp.lt.u32.totalorder %s257_s2, %s349_s3 }
 0x10d   :  { %p263_p9 = pnand %p261_p8, %p258_p7 }
 0x10f   :  { %266 = shalt.err (!%p263_p9)
}
 0x110   :  { %161 = dma.vmem_to_hbm [thread:$0]  %s156_s12, 256, %s349_s3, [#allocation4], %s274_s22, %s274_s22, %s275_s23  }
 0x111   :  { %271 = dma.done.wait [#allocation4], 256  }
 0x112   :  { %272 = vsyncadd [#allocation4], 4294967040 }
 0x113   :  { %165 = vsyncpa [#allocation3], 1 }
 0x114   :  { %166 = vsyncpa [#allocation6], 1 }
 0x115   :  { %167 = vsyncpa [#allocation4], 1 }

</bundles_post_ra>
